<compile_context>
chip_gen: v5e
topology: v5e:2x2
jax: 0.10.0
libtpu: 0.0.40
codegen_flags: <defaults>
</compile_context>

<pallas_src>
import jax
import jax.numpy as jnp
from jax.experimental import pallas as pl
from jax.experimental.pallas import tpu as pltpu


def _round_up(x: int, m: int) -> int:
    return ((x + m - 1) // m) * m


def _choose_tile(size: int, target: int, align: int):
    """Pick (tile, padded_size): biggest tile <= target keeping padding modest."""
    size_al = _round_up(size, align)
    if size_al <= target:
        return size_al, size_al  # single full-extent block, zero extra padding
    best = (align, _round_up(size_al, align))
    tile = (target // align) * align
    while tile >= align:
        padded = _round_up(size_al, tile)
        if (padded - size_al) / padded <= 0.125:
            return tile, padded
        if padded < best[1] or (padded == best[1] and tile > best[0]):
            best = (tile, padded)
        tile -= align
    return best


def _chip_config():
    """Tile targets + VMEM cap per TPU generation (conservative fallback = v7x)."""
    try:
        vmem_cap = pltpu.get_tpu_info().vmem_capacity_bytes
    except Exception:
        vmem_cap = 64 * 1024 * 1024
    if vmem_cap >= 100 * 1024 * 1024:  # v5e / v6e: 128 MiB physical VMEM
        return dict(tm=1024, tn=1024, tk=1024, vmem_limit=96 * 1024 * 1024)
    # v7x (64 MiB per TC) or unknown: keep total block footprint well under 48 MiB.
    return dict(tm=512, tn=512, tk=1024, vmem_limit=48 * 1024 * 1024)


def binary_linear_kernel(x_ref, w_ref, b_ref, o_ref):
    k = pl.program_id(2)

    # bf16 x bf16 -> f32 on the MXU; operands are pre-binarized, rhs pre-transposed.
    partial = jnp.dot(x_ref[...], w_ref[...], preferred_element_type=jnp.float32)

    @pl.when(k == 0)
    def _():
        o_ref[...] = partial

    @pl.when(k != 0)
    def _():
        o_ref[...] += partial

    @pl.when(k == pl.num_programs(2) - 1)
    def _():
        # Bias add only on the finalize path; (1, tn) broadcasts over tm rows.
        o_ref[...] += b_ref[...]


def _prepare_weight(weight, bias, K: int, N: int):
    """sign -> bf16 -> transpose -> pad.  Hoist/cache this for inference."""
    out_features, in_features = weight.shape
    w_t = jnp.sign(weight).astype(jnp.bfloat16).T  # (K_raw, N_raw); {-1,0,+1} exact
    if (K, N) != (in_features, out_features):
        w_t = jnp.zeros((K, N), jnp.bfloat16).at[:in_features, :out_features].set(w_t)
    b = bias.astype(jnp.float32)
    if N != out_features:
        b = jnp.zeros((N,), jnp.float32).at[:out_features].set(b)
    return w_t, b.reshape(1, N)


@jax.jit
def binary_linear(x, weight, bias):
    """BinaryDecorator(nn.Linear).forward (weights re-signed each call)."""
    batch, in_features = x.shape
    out_features = weight.shape[0]

    cfg = _chip_config()
    tm, M = _choose_tile(batch, cfg["tm"], 16)        # bf16 x sublane packing
    tk, K = _choose_tile(in_features, cfg["tk"], 128)
    tn, N = _choose_tile(out_features, cfg["tn"], 128)

    # Guarantee >=2 blocks on a parallel axis when possible (v7x: 2 TensorCores).
    if (M // tm) * (N // tn) == 1:
        if tn % 256 == 0:
            tn //= 2
        elif tm % 32 == 0:
            tm //= 2

    # Binarize activations in the wrapper, fused with padding.  Binarize BEFORE the
    # bf16 cast so tiny positives don't round to 0 and flip sign to -1.
    x_bin = jnp.where(x > 0, 1.0, -1.0).astype(jnp.bfloat16)
    if (M, K) != (batch, in_features):
        x_bin = jnp.zeros((M, K), jnp.bfloat16).at[:batch, :in_features].set(x_bin)

    w_p, b_p = _prepare_weight(weight, bias, K, N)

    grid = (M // tm, N // tn, K // tk)
    bytes_accessed = (M * K * 2) * (N // tn) + (K * N * 2) * (M // tm) + M * N * 4

    out = pl.pallas_call(
        binary_linear_kernel,
        out_shape=jax.ShapeDtypeStruct((M, N), jnp.float32),
        grid=grid,
        in_specs=[
            pl.BlockSpec((tm, tk), lambda i, j, k: (i, k)),   # bf16 binarized x tile
            pl.BlockSpec((tk, tn), lambda i, j, k: (k, j)),   # pre-transposed W tile
            pl.BlockSpec((1, tn), lambda i, j, k: (0, j)),    # bias tile
        ],
        out_specs=pl.BlockSpec((tm, tn), lambda i, j, k: (i, j)),
        compiler_params=pltpu.CompilerParams(
            dimension_semantics=("parallel", "parallel", "arbitrary"),
            vmem_limit_bytes=cfg["vmem_limit"],
        ),
        cost_estimate=pl.CostEstimate(
            flops=2 * M * N * K, transcendentals=0, bytes_accessed=bytes_accessed
        ),
    )(x_bin, w_p, b_p)

    if (M, N) != (batch, out_features):
        out = out[:batch, :out_features]
    return out


if __name__ == "__main__":
    key = jax.random.PRNGKey(0)
    kx, kw, kb = jax.random.split(key, 3)

    # Small shapes that still exercise the padding / slicing paths.
    batch, in_features, out_features = 8, 96, 80

    x = jax.random.normal(kx, (batch, in_features), dtype=jnp.float32)
    weight = jax.random.uniform(
        kw, (out_features, in_features), minval=-1.0, maxval=1.0, dtype=jnp.float32
    )
    bias = jax.random.uniform(
        kb, (out_features,), minval=-0.1, maxval=0.1, dtype=jnp.float32
    )

    out = binary_linear(x, weight, bias)
    out = jax.block_until_ready(out)

    # Pure-JAX reference of the same semantics.
    x_bin = jnp.where(x > 0, 1.0, -1.0)
    ref = x_bin @ jnp.sign(weight).T + bias
    assert out.shape == ref.shape, f"shape mismatch {out.shape} vs {ref.shape}"
    assert jnp.allclose(out, ref, atol=1e-5, rtol=1e-5), "mismatch vs reference"

    print("KERNEL_OK")
</pallas_src>

<mosaic_0001>
module attributes {stable_mosaic.version = 11 : i64} {
  func.func @binary_linear_kernel(%arg0: i32, %arg1: i32, %arg2: i32, %arg3: memref<16x128xbf16, #tpu.memory_space<vmem>>, %arg4: memref<128x128xbf16, #tpu.memory_space<vmem>>, %arg5: memref<1x128xf32, #tpu.memory_space<vmem>>, %arg6: memref<16x128xf32, #tpu.memory_space<vmem>>) attributes {dimension_semantics = [#tpu.dimension_semantics<parallel>, #tpu.dimension_semantics<parallel>, #tpu.dimension_semantics<arbitrary>], iteration_bounds = array<i64: 1, 1, 1>, scalar_prefetch = 0 : i64, scratch_operands = 0 : i64, tpu.core_type = #tpu.core_type<tc>, window_params = [{transform_indices = @transform_0, window_bounds = array<i64: 16, 128>}, {transform_indices = @transform_1, window_bounds = array<i64: 128, 128>}, {transform_indices = @transform_2, window_bounds = array<i64: 1, 128>}, {transform_indices = @transform_3, window_bounds = array<i64: 16, 128>}]} {
    %c0 = arith.constant 0 : index
    %c0_0 = arith.constant 0 : index
    %0 = vector.load %arg3[%c0, %c0_0] : memref<16x128xbf16, #tpu.memory_space<vmem>>, vector<16x128xbf16>
    %c0_1 = arith.constant 0 : index
    %c0_2 = arith.constant 0 : index
    %1 = vector.load %arg4[%c0_1, %c0_2] : memref<128x128xbf16, #tpu.memory_space<vmem>>, vector<128x128xbf16>
    %cst = arith.constant dense<0.000000e+00> : vector<16x128xf32>
    %2 = tpu.matmul %0, %1, %cst {dimension_numbers = #tpu.dot_dimension_numbers<[1], [0], [0], [1], [0, 0, 1, 1], [], []>} : vector<16x128xbf16>, vector<128x128xbf16>, vector<16x128xf32> -> vector<16x128xf32>
    %c0_i32 = arith.constant 0 : i32
    %3 = arith.cmpi eq, %arg2, %c0_i32 : i32
    %4 = arith.extui %3 : i1 to i32
    %c0_i32_3 = arith.constant 0 : i32
    %5 = arith.cmpi ne, %4, %c0_i32_3 : i32
    scf.if %5 {
      %c0_8 = arith.constant 0 : index
      %c0_9 = arith.constant 0 : index
      %12 = vector.load %arg6[%c0_8, %c0_9] : memref<16x128xf32, #tpu.memory_space<vmem>>, vector<16x128xf32>
      tpu.vector_store %arg6[%c0_8, %c0_9], %2 {strides = array<i32>} : memref<16x128xf32, #tpu.memory_space<vmem>>, vector<16x128xf32>,
    } else {
    }
    %c0_i32_4 = arith.constant 0 : i32
    %6 = arith.cmpi ne, %arg2, %c0_i32_4 : i32
    %7 = arith.extui %6 : i1 to i32
    %c0_i32_5 = arith.constant 0 : i32
    %8 = arith.cmpi ne, %7, %c0_i32_5 : i32
    scf.if %8 {
      %c0_8 = arith.constant 0 : index
      %c0_9 = arith.constant 0 : index
      %12 = vector.load %arg6[%c0_8, %c0_9] : memref<16x128xf32, #tpu.memory_space<vmem>>, vector<16x128xf32>
      %13 = arith.addf %12, %2 : vector<16x128xf32>
      %c0_10 = arith.constant 0 : index
      %c0_11 = arith.constant 0 : index
      %14 = vector.load %arg6[%c0_10, %c0_11] : memref<16x128xf32, #tpu.memory_space<vmem>>, vector<16x128xf32>
      tpu.vector_store %arg6[%c0_10, %c0_11], %13 {strides = array<i32>} : memref<16x128xf32, #tpu.memory_space<vmem>>, vector<16x128xf32>,
    } else {
    }
    %c0_i32_6 = arith.constant 0 : i32
    %9 = arith.cmpi eq, %arg2, %c0_i32_6 : i32
    %10 = arith.extui %9 : i1 to i32
    %c0_i32_7 = arith.constant 0 : i32
    %11 = arith.cmpi ne, %10, %c0_i32_7 : i32
    scf.if %11 {
      %c0_8 = arith.constant 0 : index
      %c0_9 = arith.constant 0 : index
      %12 = vector.load %arg6[%c0_8, %c0_9] : memref<16x128xf32, #tpu.memory_space<vmem>>, vector<16x128xf32>
      %c0_10 = arith.constant 0 : index
      %c0_11 = arith.constant 0 : index
      %13 = vector.load %arg5[%c0_10, %c0_11] : memref<1x128xf32, #tpu.memory_space<vmem>>, vector<1x128xf32>
      %14 = vector.broadcast %13 : vector<1x128xf32> to vector<16x128xf32>
      %15 = arith.addf %12, %14 : vector<16x128xf32>
      %c0_12 = arith.constant 0 : index
      %c0_13 = arith.constant 0 : index
      %16 = vector.load %arg6[%c0_12, %c0_13] : memref<16x128xf32, #tpu.memory_space<vmem>>, vector<16x128xf32>
      tpu.vector_store %arg6[%c0_12, %c0_13], %15 {strides = array<i32>} : memref<16x128xf32, #tpu.memory_space<vmem>>, vector<16x128xf32>,
    } else {
    }
    return
  }
  func.func @transform_0(%arg0: i32, %arg1: i32, %arg2: i32) -> (i32, i32) {
    %c0_i32 = arith.constant 0 : i32
    return %arg0, %arg2 : i32, i32
  }
  func.func @transform_1(%arg0: i32, %arg1: i32, %arg2: i32) -> (i32, i32) {
    %c0_i32 = arith.constant 0 : i32
    return %arg2, %arg1 : i32, i32
  }
  func.func @transform_2(%arg0: i32, %arg1: i32, %arg2: i32) -> (i32, i32) {
    %c0_i32 = arith.constant 0 : i32
    %c0_i32_0 = arith.constant 0 : i32
    return %c0_i32, %arg1 : i32, i32
  }
  func.func @transform_3(%arg0: i32, %arg1: i32, %arg2: i32) -> (i32, i32) {
    %c0_i32 = arith.constant 0 : i32
    return %arg0, %arg1 : i32, i32
  }
}

</mosaic_0001>

<bundles_post_ra>
// kernel: binary_linear.1
= control target key start
LH: loop header
LB: loop body
LE: loop exit
PB: predicated region body
PF: predicated region fallthrough
CT: control target
= control target key end

     0   :  { %s235_s1 = inlined_call_operand.vmem [shape: bf16[128,128], index: 1, kind: input, shape index: {}]   ;;  %s236_s2 = inlined_call_operand.vmem [shape: f32[1,128], index: 2, kind: input, shape index: {}]   ;;  %s237_s0 = inlined_call_operand.vmem [shape: bf16[16,128], index: 0, kind: input, shape index: {}]   ;;  %s238_s3 = inlined_call_operand.vmem [shape: f32[16,128], index: 3, kind: output, shape index: {}]  }
   0x1   :  { %v177_v0 = vld [vmem:[%s235_s1 + $0x38] sm:$0xff]  ;;  %v176_v1 = vld [vmem:[%s235_s1 + $0x30] sm:$0xff]  ;;  %v175_v2 = vld [vmem:[%s235_s1 + $0x28] sm:$0xff] }
   0x2   :  { %86 = vmatpush.bf16.msra.mxu0 %v177_v0  ;;  %v174_v3 = vld [vmem:[%s235_s1 + $0x20] sm:$0xff]  ;;  %v173_v4 = vld [vmem:[%s235_s1 + $0x18] sm:$0xff]  ;;  %v172_v5 = vld [vmem:[%s235_s1 + $0x10] sm:$0xff] }
   0x3   :  { %v171_v6 = vld [vmem:[%s235_s1 + $0x8] sm:$0xff]  ;;  %v170_v7 = vld [vmem:[%s235_s1] sm:$0xff] }
   0x4   :  { %v169_v8 = vld [vmem:[%s237_s0] sm:$0xff] }
   0x5   :  { %v178_v9 = vld [vmem:[%s236_s2] ss:$0 sm:$0xff] }
   0x6   :  { %87 = vmatpush.bf16.msra.mxu0 %v176_v1 }
   0xa   :  { %88 = vmatpush.bf16.msra.mxu0 %v175_v2 }
   0xe   :  { %89 = vmatpush.bf16.msra.mxu0 %v174_v3 }
  0x12   :  { %90 = vmatpush.bf16.msra.mxu0 %v173_v4 }
  0x16   :  { %91 = vmatpush.bf16.msra.mxu0 %v172_v5 }
  0x1a   :  { %92 = vmatpush.bf16.msra.mxu0 %v171_v6 }
  0x1e   :  { %93 = vmatpush.bf16.msra.mxu0 %v170_v7 }
  0x21   :  { %94 = vmatmul.bf16.vlgmr.msra.gmra.mxu0 %v169_v8 }
  0x9e   :  { %v95_v10 = vpop.f32.mrf.mxu0 }
  0x9f   :  { %v125_v11 = vadd.f32 %v178_v9, %v95_v10 }
  0xa1   :  { %127 = vst [vmem:[%s238_s3] sm:$0xff] %v125_v11 }
  0xa6   :  { %v97_v12 = vpop.f32.mrf.mxu0 }
  0xa7   :  { %v126_v13 = vadd.f32 %v178_v9, %v97_v12 }
  0xa9   :  { %128 = vst [vmem:[%s238_s3 + $0x8] sm:$0xff] %v126_v13 }

</bundles_post_ra>
